<compile_context>
chip_gen: v6e
topology: v6e:2x2x1
jax: 0.10.0
libtpu: 0.0.40
codegen_flags: <defaults>
</compile_context>

<pallas_src>
from functools import partial

import numpy as np
import jax
import jax.numpy as jnp
from jax.experimental import pallas as pl
from jax.experimental.pallas import tpu as pltpu


def residual_block_kernel(x_ref, b1_ref, b2_ref, g1_ref, be1_ref, g2_ref,
                          be2_ref, o_ref, *, C):
    """Fused conv3x3 -> BN -> relu -> conv3x3 -> BN -> +residual -> relu.

    x_ref   : (N, H, W*C)    input activation (NHWC with W,C merged into lanes)
    b1/b2   : (3, W*C, W*C)  banded conv weights, one matrix per kh tap
    g*/be*  : (1, W*C)       BN gamma/beta pre-tiled to the (w, c) lane layout
    o_ref   : (N*H, W*C)     output slab
    """
    N, H, WC = x_ref.shape
    W = WC // C
    eps = 1e-5
    inv_cnt = 1.0 / float(N * H * W)

    # Per-channel lane masks, built once and reused by both BN calls
    # (JAX does not CSE broadcast/iota, so hoist them).
    lane_c = jax.lax.broadcasted_iota(jnp.int32, (1, WC), 1) % C
    masks = [(lane_c == c).astype(jnp.float32) for c in range(C)]

    def conv3x3(src, bands_ref):
        # src: (N, H, WC) -> (N*H, WC).  One MXU matmul per kh tap; the kw
        # shift + width zero-pad live inside the band matrix, the height
        # zero-pad is a value-level concat (no scratch round-trip).
        z = jnp.zeros((N, 1, WC), jnp.float32)
        sp = jnp.concatenate([z, src, z], axis=1)            # (N, H+2, WC)
        acc = jnp.zeros((N * H, WC), jnp.float32)
        for kh in range(3):
            sl = sp[:, kh:kh + H, :].reshape(N * H, WC)
            acc = acc + jnp.dot(sl, bands_ref[kh],
                                preferred_element_type=jnp.float32)
        return acc                                           # (N*H, WC)

    def batchnorm(y2d, g_lane, b_lane):
        # Train-mode BN: batch stats, biased variance, computed in one pass
        # (sum & sum-of-squares) and folded into per-lane scale/shift.
        lane_sum = jnp.sum(y2d, axis=0, keepdims=True)        # (1, WC)
        lane_sq = jnp.sum(y2d * y2d, axis=0, keepdims=True)   # (1, WC)
        mean_lane = jnp.zeros((1, WC), jnp.float32)
        var_lane = jnp.zeros((1, WC), jnp.float32)
        for c in range(C):                                    # C = 4, unrolled
            m = masks[c]
            s = jnp.sum(lane_sum * m, axis=1, keepdims=True)      # (1, 1)
            sq = jnp.sum(lane_sq * m, axis=1, keepdims=True)      # (1, 1)
            mean_c = s * inv_cnt
            var_c = sq * inv_cnt - mean_c * mean_c
            mean_lane = mean_lane + mean_c * m
            var_lane = var_lane + var_c * m
        scale = g_lane * jax.lax.rsqrt(var_lane + eps)        # (1, WC)
        shift = b_lane - mean_lane * scale                    # (1, WC)
        return y2d * scale + shift

    x = x_ref[...]                                            # (N, H, WC)

    # conv1 -> BN1 -> relu
    y = jnp.maximum(batchnorm(conv3x3(x, b1_ref), g1_ref[...], be1_ref[...]),
                    0.0)                                      # (N*H, WC)
    # conv2 -> BN2
    out = batchnorm(conv3x3(y.reshape(N, H, WC), b2_ref),
                    g2_ref[...], be2_ref[...])                # (N*H, WC)
    # + residual -> relu
    o_ref[...] = jnp.maximum(out + x.reshape(N * H, WC), 0.0)


def _band_weights(w_oihw, W, C):
    """torch conv weight (O, I, kh, kw) -> 3 banded (W*C, W*C) matrices.

    band[kh][w_in*C + ci, w_out*C + co] = w[co, ci, kh, w_in - w_out + 1]
    (zero when the kw tap falls outside [0, 3) or w_in outside [0, W), which
    folds the width zero-padding into the weights).
    """
    wt = jnp.transpose(w_oihw.astype(jnp.float32), (2, 3, 1, 0))  # (kh,kw,ci,co)
    S = np.zeros((3, W, W), np.float32)
    for kw in range(3):
        for w_out in range(W):
            w_in = w_out + kw - 1
            if 0 <= w_in < W:
                S[kw, w_in, w_out] = 1.0
    bands = jnp.einsum('kIO,hkio->hIiOo', jnp.asarray(S), wt)    # (3,W,C,W,C)
    return bands.reshape(3, W * C, W * C)


def residual_block(x_nchw, w1_oihw, w2_oihw, g1, b1, g2, b2):
    """Wrapper: NCHW in / NCHW out; layout bookkeeping done outside the kernel."""
    N, C, H, W = x_nchw.shape
    WC = W * C
    # NCHW -> lane-dense (N, H, W*C) slab (NHWC with W and C merged into lanes)
    x = jnp.transpose(x_nchw, (0, 2, 3, 1)).astype(jnp.float32).reshape(N, H, WC)

    def lane(v):                        # per-channel (C,) -> per-lane (1, W*C)
        return jnp.tile(v.astype(jnp.float32).reshape(1, C), (1, W))

    out2d = pl.pallas_call(
        partial(residual_block_kernel, C=C),
        out_shape=jax.ShapeDtypeStruct((N * H, WC), jnp.float32),
        in_specs=[pl.BlockSpec(memory_space=pltpu.MemorySpace.VMEM)] * 7,
        out_specs=pl.BlockSpec(memory_space=pltpu.MemorySpace.VMEM),
    )(x, _band_weights(w1_oihw, W, C), _band_weights(w2_oihw, W, C),
      lane(g1), lane(b1), lane(g2), lane(b2))

    return jnp.transpose(out2d.reshape(N, H, W, C), (0, 3, 1, 2))   # back to NCHW


def reference(x, w1, w2, g1, b1, g2, b2):
    """Pure-JAX reference mirroring the PyTorch forward (train-mode BN)."""
    def conv(x, w):
        return jax.lax.conv_general_dilated(
            x, w, (1, 1), [(1, 1), (1, 1)],
            dimension_numbers=('NCHW', 'OIHW', 'NCHW'))

    def bn(x, g, b):
        m = jnp.mean(x, axis=(0, 2, 3), keepdims=True)
        v = jnp.mean((x - m) ** 2, axis=(0, 2, 3), keepdims=True)
        return (x - m) * jax.lax.rsqrt(v + 1e-5) * g.reshape(1, -1, 1, 1) \
               + b.reshape(1, -1, 1, 1)

    out = jax.nn.relu(bn(conv(x, w1), g1, b1))
    out = bn(conv(out, w2), g2, b2)
    return jax.nn.relu(out + x)


if __name__ == "__main__":
    # ResidualBlock(in_channels=4, out_channels=4, kernel_size=3, padding=1, stride=1)
    N, C, H, W = 2, 4, 16, 16
    key = jax.random.PRNGKey(0)
    kx, kw1, kw2, kg1, kb1, kg2, kb2 = jax.random.split(key, 7)

    x = jax.random.normal(kx, (N, C, H, W), jnp.float32)
    w1 = jax.random.normal(kw1, (C, C, 3, 3), jnp.float32) * 0.2   # conv_res1.weight (O,I,kh,kw)
    w2 = jax.random.normal(kw2, (C, C, 3, 3), jnp.float32) * 0.2   # conv_res2.weight
    g1 = 1.0 + 0.1 * jax.random.normal(kg1, (C,), jnp.float32)     # bn1 gamma
    b1 = 0.1 * jax.random.normal(kb1, (C,), jnp.float32)           # bn1 beta
    g2 = 1.0 + 0.1 * jax.random.normal(kg2, (C,), jnp.float32)     # bn2 gamma
    b2 = 0.1 * jax.random.normal(kb2, (C,), jnp.float32)           # bn2 beta

    out = residual_block(x, w1, w2, g1, b1, g2, b2)
    out = jax.block_until_ready(out)

    ref = jax.block_until_ready(reference(x, w1, w2, g1, b1, g2, b2))
    assert out.shape == (N, C, H, W)
    if not jnp.allclose(out, ref, atol=1e-3, rtol=1e-3):
        raise AssertionError("Pallas kernel output does not match JAX reference")

    print("KERNEL_OK")
</pallas_src>

<mosaic_0001>
module attributes {stable_mosaic.version = 11 : i64} {
  func.func @residual_block_kernel(%arg0: memref<2x16x64xf32, #tpu.memory_space<vmem>>, %arg1: memref<3x64x64xf32, #tpu.memory_space<vmem>>, %arg2: memref<3x64x64xf32, #tpu.memory_space<vmem>>, %arg3: memref<1x64xf32, #tpu.memory_space<vmem>>, %arg4: memref<1x64xf32, #tpu.memory_space<vmem>>, %arg5: memref<1x64xf32, #tpu.memory_space<vmem>>, %arg6: memref<1x64xf32, #tpu.memory_space<vmem>>, %arg7: memref<32x64xf32, #tpu.memory_space<vmem>>) attributes {dimension_semantics = [], scalar_prefetch = 0 : i64, scratch_operands = 0 : i64, tpu.core_type = #tpu.core_type<tc>} {
    %0 = tpu.iota {dimensions = array<i32: 1>} : vector<1x64xi32>
    %c4_i32 = arith.constant 4 : i32
    %c0_i32 = arith.constant 0 : i32
    %1 = arith.cmpi eq, %c4_i32, %c0_i32 : i32
    %c1_i32 = arith.constant 1 : i32
    %2 = arith.select %1, %c1_i32, %c4_i32 : i32
    %3 = vector.broadcast %2 : i32 to vector<1x64xi32>
    %4 = arith.remsi %0, %3 : vector<1x64xi32>
    %c0_i32_0 = arith.constant 0 : i32
    %5 = vector.broadcast %c0_i32_0 : i32 to vector<1x64xi32>
    %6 = arith.cmpi ne, %4, %5 : vector<1x64xi32>
    %c0_i32_1 = arith.constant 0 : i32
    %7 = vector.broadcast %c0_i32_1 : i32 to vector<1x64xi32>
    %8 = arith.cmpi slt, %4, %7 : vector<1x64xi32>
    %c0_i32_2 = arith.constant 0 : i32
    %9 = arith.cmpi slt, %2, %c0_i32_2 : i32
    %10 = vector.broadcast %9 : i1 to vector<1x64xi1>
    %11 = vector.broadcast %10 : vector<1x64xi1> to vector<1x64xi1>
    %12 = arith.xori %8, %11 : vector<1x64xi1>
    %13 = arith.andi %12, %6 : vector<1x64xi1>
    %14 = vector.broadcast %2 : i32 to vector<1x64xi32>
    %15 = arith.addi %4, %14 : vector<1x64xi32>
    %16 = arith.select %13, %15, %4 : vector<1x64xi1>, vector<1x64xi32>
    %c0_i32_3 = arith.constant 0 : i32
    %17 = vector.broadcast %c0_i32_3 : i32 to vector<1x64xi32>
    %18 = arith.cmpi eq, %16, %17 : vector<1x64xi32>
    %19 = arith.extui %18 : vector<1x64xi1> to vector<1x64xi32>
    %20 = arith.sitofp %19 : vector<1x64xi32> to vector<1x64xf32>
    %c1_i32_4 = arith.constant 1 : i32
    %21 = vector.broadcast %c1_i32_4 : i32 to vector<1x64xi32>
    %22 = arith.cmpi eq, %16, %21 : vector<1x64xi32>
    %23 = arith.extui %22 : vector<1x64xi1> to vector<1x64xi32>
    %24 = arith.sitofp %23 : vector<1x64xi32> to vector<1x64xf32>
    %c2_i32 = arith.constant 2 : i32
    %25 = vector.broadcast %c2_i32 : i32 to vector<1x64xi32>
    %26 = arith.cmpi eq, %16, %25 : vector<1x64xi32>
    %27 = arith.extui %26 : vector<1x64xi1> to vector<1x64xi32>
    %28 = arith.sitofp %27 : vector<1x64xi32> to vector<1x64xf32>
    %c3_i32 = arith.constant 3 : i32
    %29 = vector.broadcast %c3_i32 : i32 to vector<1x64xi32>
    %30 = arith.cmpi eq, %16, %29 : vector<1x64xi32>
    %31 = arith.extui %30 : vector<1x64xi1> to vector<1x64xi32>
    %32 = arith.sitofp %31 : vector<1x64xi32> to vector<1x64xf32>
    %c0 = arith.constant 0 : index
    %c0_5 = arith.constant 0 : index
    %c0_6 = arith.constant 0 : index
    %33 = vector.load %arg0[%c0, %c0_5, %c0_6] : memref<2x16x64xf32, #tpu.memory_space<vmem>>, vector<2x16x64xf32>
    %cst = arith.constant 0.000000e+00 : f32
    %34 = vector.broadcast %cst : f32 to vector<2x1x64xf32>
    %35 = tpu.concatenate %34, %33, %34 in 1 : vector<2x1x64xf32>, vector<2x16x64xf32>, vector<2x1x64xf32> -> vector<2x18x64xf32>
    %cst_7 = arith.constant 0.000000e+00 : f32
    %36 = vector.broadcast %cst_7 : f32 to vector<32x64xf32>
    %37 = vector.extract_strided_slice %35 {offsets = [0, 0, 0], sizes = [2, 16, 64], strides = [1, 1, 1]} : vector<2x18x64xf32> to vector<2x16x64xf32>
    %38 = vector.shape_cast %37 : vector<2x16x64xf32> to vector<32x64xf32>
    %c0_8 = arith.constant 0 : index
    %c0_9 = arith.constant 0 : index
    %c0_10 = arith.constant 0 : index
    %39 = vector.load %arg1[%c0_8, %c0_9, %c0_10] : memref<3x64x64xf32, #tpu.memory_space<vmem>>, vector<1x64x64xf32>
    %40 = vector.shape_cast %39 : vector<1x64x64xf32> to vector<64x64xf32>
    %cst_11 = arith.constant dense<0.000000e+00> : vector<32x64xf32>
    %41 = tpu.matmul %38, %40, %cst_11 {dimension_numbers = #tpu.dot_dimension_numbers<[1], [0], [0], [1], [0, 0, 1, 1], [], []>} : vector<32x64xf32>, vector<64x64xf32>, vector<32x64xf32> -> vector<32x64xf32>
    %42 = arith.addf %36, %41 : vector<32x64xf32>
    %43 = vector.extract_strided_slice %35 {offsets = [0, 1, 0], sizes = [2, 16, 64], strides = [1, 1, 1]} : vector<2x18x64xf32> to vector<2x16x64xf32>
    %44 = vector.shape_cast %43 : vector<2x16x64xf32> to vector<32x64xf32>
    %c1 = arith.constant 1 : index
    %c0_12 = arith.constant 0 : index
    %c0_13 = arith.constant 0 : index
    %45 = vector.load %arg1[%c1, %c0_12, %c0_13] : memref<3x64x64xf32, #tpu.memory_space<vmem>>, vector<1x64x64xf32>
    %46 = vector.shape_cast %45 : vector<1x64x64xf32> to vector<64x64xf32>
    %cst_14 = arith.constant dense<0.000000e+00> : vector<32x64xf32>
    %47 = tpu.matmul %44, %46, %cst_14 {dimension_numbers = #tpu.dot_dimension_numbers<[1], [0], [0], [1], [0, 0, 1, 1], [], []>} : vector<32x64xf32>, vector<64x64xf32>, vector<32x64xf32> -> vector<32x64xf32>
    %48 = arith.addf %42, %47 : vector<32x64xf32>
    %49 = vector.extract_strided_slice %35 {offsets = [0, 2, 0], sizes = [2, 16, 64], strides = [1, 1, 1]} : vector<2x18x64xf32> to vector<2x16x64xf32>
    %50 = vector.shape_cast %49 : vector<2x16x64xf32> to vector<32x64xf32>
    %c2 = arith.constant 2 : index
    %c0_15 = arith.constant 0 : index
    %c0_16 = arith.constant 0 : index
    %51 = vector.load %arg1[%c2, %c0_15, %c0_16] : memref<3x64x64xf32, #tpu.memory_space<vmem>>, vector<1x64x64xf32>
    %52 = vector.shape_cast %51 : vector<1x64x64xf32> to vector<64x64xf32>
    %cst_17 = arith.constant dense<0.000000e+00> : vector<32x64xf32>
    %53 = tpu.matmul %50, %52, %cst_17 {dimension_numbers = #tpu.dot_dimension_numbers<[1], [0], [0], [1], [0, 0, 1, 1], [], []>} : vector<32x64xf32>, vector<64x64xf32>, vector<32x64xf32> -> vector<32x64xf32>
    %54 = arith.addf %48, %53 : vector<32x64xf32>
    %c0_18 = arith.constant 0 : index
    %c0_19 = arith.constant 0 : index
    %55 = vector.load %arg3[%c0_18, %c0_19] : memref<1x64xf32, #tpu.memory_space<vmem>>, vector<1x64xf32>
    %c0_20 = arith.constant 0 : index
    %c0_21 = arith.constant 0 : index
    %56 = vector.load %arg4[%c0_20, %c0_21] : memref<1x64xf32, #tpu.memory_space<vmem>>, vector<1x64xf32>
    %cst_22 = arith.constant dense<0.000000e+00> : vector<64xf32>
    %57 = vector.multi_reduction <add>, %54, %cst_22 [0] : vector<32x64xf32> to vector<64xf32>
    %58 = vector.shape_cast %57 : vector<64xf32> to vector<1x64xf32>
    %59 = arith.mulf %54, %54 : vector<32x64xf32>
    %cst_23 = arith.constant dense<0.000000e+00> : vector<64xf32>
    %60 = vector.multi_reduction <add>, %59, %cst_23 [0] : vector<32x64xf32> to vector<64xf32>
    %61 = vector.shape_cast %60 : vector<64xf32> to vector<1x64xf32>
    %cst_24 = arith.constant 0.000000e+00 : f32
    %62 = vector.broadcast %cst_24 : f32 to vector<1x64xf32>
    %cst_25 = arith.constant 0.000000e+00 : f32
    %63 = vector.broadcast %cst_25 : f32 to vector<1x64xf32>
    %64 = arith.mulf %58, %20 : vector<1x64xf32>
    %cst_26 = arith.constant dense<0.000000e+00> : vector<1xf32>
    %65 = vector.multi_reduction <add>, %64, %cst_26 [1] : vector<1x64xf32> to vector<1xf32>
    %66 = vector.shape_cast %65 : vector<1xf32> to vector<1x1xf32>
    %67 = arith.mulf %61, %20 : vector<1x64xf32>
    %cst_27 = arith.constant dense<0.000000e+00> : vector<1xf32>
    %68 = vector.multi_reduction <add>, %67, %cst_27 [1] : vector<1x64xf32> to vector<1xf32>
    %69 = vector.shape_cast %68 : vector<1xf32> to vector<1x1xf32>
    %cst_28 = arith.constant 0.001953125 : f32
    %70 = vector.broadcast %cst_28 : f32 to vector<1x1xf32>
    %71 = arith.mulf %66, %70 : vector<1x1xf32>
    %cst_29 = arith.constant 0.001953125 : f32
    %72 = vector.broadcast %cst_29 : f32 to vector<1x1xf32>
    %73 = arith.mulf %69, %72 : vector<1x1xf32>
    %74 = arith.mulf %71, %71 : vector<1x1xf32>
    %75 = arith.subf %73, %74 : vector<1x1xf32>
    %76 = vector.broadcast %71 : vector<1x1xf32> to vector<1x64xf32>
    %77 = arith.mulf %76, %20 : vector<1x64xf32>
    %78 = arith.addf %62, %77 : vector<1x64xf32>
    %79 = vector.broadcast %75 : vector<1x1xf32> to vector<1x64xf32>
    %80 = arith.mulf %79, %20 : vector<1x64xf32>
    %81 = arith.addf %63, %80 : vector<1x64xf32>
    %82 = arith.mulf %58, %24 : vector<1x64xf32>
    %cst_30 = arith.constant dense<0.000000e+00> : vector<1xf32>
    %83 = vector.multi_reduction <add>, %82, %cst_30 [1] : vector<1x64xf32> to vector<1xf32>
    %84 = vector.shape_cast %83 : vector<1xf32> to vector<1x1xf32>
    %85 = arith.mulf %61, %24 : vector<1x64xf32>
    %cst_31 = arith.constant dense<0.000000e+00> : vector<1xf32>
    %86 = vector.multi_reduction <add>, %85, %cst_31 [1] : vector<1x64xf32> to vector<1xf32>
    %87 = vector.shape_cast %86 : vector<1xf32> to vector<1x1xf32>
    %cst_32 = arith.constant 0.001953125 : f32
    %88 = vector.broadcast %cst_32 : f32 to vector<1x1xf32>
    %89 = arith.mulf %84, %88 : vector<1x1xf32>
    %cst_33 = arith.constant 0.001953125 : f32
    %90 = vector.broadcast %cst_33 : f32 to vector<1x1xf32>
    %91 = arith.mulf %87, %90 : vector<1x1xf32>
    %92 = arith.mulf %89, %89 : vector<1x1xf32>
    %93 = arith.subf %91, %92 : vector<1x1xf32>
    %94 = vector.broadcast %89 : vector<1x1xf32> to vector<1x64xf32>
    %95 = arith.mulf %94, %24 : vector<1x64xf32>
    %96 = arith.addf %78, %95 : vector<1x64xf32>
    %97 = vector.broadcast %93 : vector<1x1xf32> to vector<1x64xf32>
    %98 = arith.mulf %97, %24 : vector<1x64xf32>
    %99 = arith.addf %81, %98 : vector<1x64xf32>
    %100 = arith.mulf %58, %28 : vector<1x64xf32>
    %cst_34 = arith.constant dense<0.000000e+00> : vector<1xf32>
    %101 = vector.multi_reduction <add>, %100, %cst_34 [1] : vector<1x64xf32> to vector<1xf32>
    %102 = vector.shape_cast %101 : vector<1xf32> to vector<1x1xf32>
    %103 = arith.mulf %61, %28 : vector<1x64xf32>
    %cst_35 = arith.constant dense<0.000000e+00> : vector<1xf32>
    %104 = vector.multi_reduction <add>, %103, %cst_35 [1] : vector<1x64xf32> to vector<1xf32>
    %105 = vector.shape_cast %104 : vector<1xf32> to vector<1x1xf32>
    %cst_36 = arith.constant 0.001953125 : f32
    %106 = vector.broadcast %cst_36 : f32 to vector<1x1xf32>
    %107 = arith.mulf %102, %106 : vector<1x1xf32>
    %cst_37 = arith.constant 0.001953125 : f32
    %108 = vector.broadcast %cst_37 : f32 to vector<1x1xf32>
    %109 = arith.mulf %105, %108 : vector<1x1xf32>
    %110 = arith.mulf %107, %107 : vector<1x1xf32>
    %111 = arith.subf %109, %110 : vector<1x1xf32>
    %112 = vector.broadcast %107 : vector<1x1xf32> to vector<1x64xf32>
    %113 = arith.mulf %112, %28 : vector<1x64xf32>
    %114 = arith.addf %96, %113 : vector<1x64xf32>
    %115 = vector.broadcast %111 : vector<1x1xf32> to vector<1x64xf32>
    %116 = arith.mulf %115, %28 : vector<1x64xf32>
    %117 = arith.addf %99, %116 : vector<1x64xf32>
    %118 = arith.mulf %58, %32 : vector<1x64xf32>
    %cst_38 = arith.constant dense<0.000000e+00> : vector<1xf32>
    %119 = vector.multi_reduction <add>, %118, %cst_38 [1] : vector<1x64xf32> to vector<1xf32>
    %120 = vector.shape_cast %119 : vector<1xf32> to vector<1x1xf32>
    %121 = arith.mulf %61, %32 : vector<1x64xf32>
    %cst_39 = arith.constant dense<0.000000e+00> : vector<1xf32>
    %122 = vector.multi_reduction <add>, %121, %cst_39 [1] : vector<1x64xf32> to vector<1xf32>
    %123 = vector.shape_cast %122 : vector<1xf32> to vector<1x1xf32>
    %cst_40 = arith.constant 0.001953125 : f32
    %124 = vector.broadcast %cst_40 : f32 to vector<1x1xf32>
    %125 = arith.mulf %120, %124 : vector<1x1xf32>
    %cst_41 = arith.constant 0.001953125 : f32
    %126 = vector.broadcast %cst_41 : f32 to vector<1x1xf32>
    %127 = arith.mulf %123, %126 : vector<1x1xf32>
    %128 = arith.mulf %125, %125 : vector<1x1xf32>
    %129 = arith.subf %127, %128 : vector<1x1xf32>
    %130 = vector.broadcast %125 : vector<1x1xf32> to vector<1x64xf32>
    %131 = arith.mulf %130, %32 : vector<1x64xf32>
    %132 = arith.addf %114, %131 : vector<1x64xf32>
    %133 = vector.broadcast %129 : vector<1x1xf32> to vector<1x64xf32>
    %134 = arith.mulf %133, %32 : vector<1x64xf32>
    %135 = arith.addf %117, %134 : vector<1x64xf32>
    %cst_42 = arith.constant 9.99999974E-6 : f32
    %136 = vector.broadcast %cst_42 : f32 to vector<1x64xf32>
    %137 = arith.addf %135, %136 : vector<1x64xf32>
    %138 = math.rsqrt %137 : vector<1x64xf32>
    %139 = arith.mulf %55, %138 : vector<1x64xf32>
    %140 = arith.mulf %132, %139 : vector<1x64xf32>
    %141 = arith.subf %56, %140 : vector<1x64xf32>
    %142 = vector.broadcast %139 : vector<1x64xf32> to vector<32x64xf32>
    %143 = arith.mulf %54, %142 : vector<32x64xf32>
    %144 = vector.broadcast %141 : vector<1x64xf32> to vector<32x64xf32>
    %145 = arith.addf %143, %144 : vector<32x64xf32>
    %cst_43 = arith.constant 0.000000e+00 : f32
    %146 = vector.broadcast %cst_43 : f32 to vector<32x64xf32>
    %147 = arith.maximumf %145, %146 : vector<32x64xf32>
    %148 = vector.shape_cast %147 : vector<32x64xf32> to vector<2x16x64xf32>
    %cst_44 = arith.constant 0.000000e+00 : f32
    %149 = vector.broadcast %cst_44 : f32 to vector<2x1x64xf32>
    %150 = tpu.concatenate %149, %148, %149 in 1 : vector<2x1x64xf32>, vector<2x16x64xf32>, vector<2x1x64xf32> -> vector<2x18x64xf32>
    %cst_45 = arith.constant 0.000000e+00 : f32
    %151 = vector.broadcast %cst_45 : f32 to vector<32x64xf32>
    %152 = vector.extract_strided_slice %150 {offsets = [0, 0, 0], sizes = [2, 16, 64], strides = [1, 1, 1]} : vector<2x18x64xf32> to vector<2x16x64xf32>
    %153 = vector.shape_cast %152 : vector<2x16x64xf32> to vector<32x64xf32>
    %c0_46 = arith.constant 0 : index
    %c0_47 = arith.constant 0 : index
    %c0_48 = arith.constant 0 : index
    %154 = vector.load %arg2[%c0_46, %c0_47, %c0_48] : memref<3x64x64xf32, #tpu.memory_space<vmem>>, vector<1x64x64xf32>
    %155 = vector.shape_cast %154 : vector<1x64x64xf32> to vector<64x64xf32>
    %cst_49 = arith.constant dense<0.000000e+00> : vector<32x64xf32>
    %156 = tpu.matmul %153, %155, %cst_49 {dimension_numbers = #tpu.dot_dimension_numbers<[1], [0], [0], [1], [0, 0, 1, 1], [], []>} : vector<32x64xf32>, vector<64x64xf32>, vector<32x64xf32> -> vector<32x64xf32>
    %157 = arith.addf %151, %156 : vector<32x64xf32>
    %158 = vector.extract_strided_slice %150 {offsets = [0, 1, 0], sizes = [2, 16, 64], strides = [1, 1, 1]} : vector<2x18x64xf32> to vector<2x16x64xf32>
    %159 = vector.shape_cast %158 : vector<2x16x64xf32> to vector<32x64xf32>
    %c1_50 = arith.constant 1 : index
    %c0_51 = arith.constant 0 : index
    %c0_52 = arith.constant 0 : index
    %160 = vector.load %arg2[%c1_50, %c0_51, %c0_52] : memref<3x64x64xf32, #tpu.memory_space<vmem>>, vector<1x64x64xf32>
    %161 = vector.shape_cast %160 : vector<1x64x64xf32> to vector<64x64xf32>
    %cst_53 = arith.constant dense<0.000000e+00> : vector<32x64xf32>
    %162 = tpu.matmul %159, %161, %cst_53 {dimension_numbers = #tpu.dot_dimension_numbers<[1], [0], [0], [1], [0, 0, 1, 1], [], []>} : vector<32x64xf32>, vector<64x64xf32>, vector<32x64xf32> -> vector<32x64xf32>
    %163 = arith.addf %157, %162 : vector<32x64xf32>
    %164 = vector.extract_strided_slice %150 {offsets = [0, 2, 0], sizes = [2, 16, 64], strides = [1, 1, 1]} : vector<2x18x64xf32> to vector<2x16x64xf32>
    %165 = vector.shape_cast %164 : vector<2x16x64xf32> to vector<32x64xf32>
    %c2_54 = arith.constant 2 : index
    %c0_55 = arith.constant 0 : index
    %c0_56 = arith.constant 0 : index
    %166 = vector.load %arg2[%c2_54, %c0_55, %c0_56] : memref<3x64x64xf32, #tpu.memory_space<vmem>>, vector<1x64x64xf32>
    %167 = vector.shape_cast %166 : vector<1x64x64xf32> to vector<64x64xf32>
    %cst_57 = arith.constant dense<0.000000e+00> : vector<32x64xf32>
    %168 = tpu.matmul %165, %167, %cst_57 {dimension_numbers = #tpu.dot_dimension_numbers<[1], [0], [0], [1], [0, 0, 1, 1], [], []>} : vector<32x64xf32>, vector<64x64xf32>, vector<32x64xf32> -> vector<32x64xf32>
    %169 = arith.addf %163, %168 : vector<32x64xf32>
    %c0_58 = arith.constant 0 : index
    %c0_59 = arith.constant 0 : index
    %170 = vector.load %arg5[%c0_58, %c0_59] : memref<1x64xf32, #tpu.memory_space<vmem>>, vector<1x64xf32>
    %c0_60 = arith.constant 0 : index
    %c0_61 = arith.constant 0 : index
    %171 = vector.load %arg6[%c0_60, %c0_61] : memref<1x64xf32, #tpu.memory_space<vmem>>, vector<1x64xf32>
    %cst_62 = arith.constant dense<0.000000e+00> : vector<64xf32>
    %172 = vector.multi_reduction <add>, %169, %cst_62 [0] : vector<32x64xf32> to vector<64xf32>
    %173 = vector.shape_cast %172 : vector<64xf32> to vector<1x64xf32>
    %174 = arith.mulf %169, %169 : vector<32x64xf32>
    %cst_63 = arith.constant dense<0.000000e+00> : vector<64xf32>
    %175 = vector.multi_reduction <add>, %174, %cst_63 [0] : vector<32x64xf32> to vector<64xf32>
    %176 = vector.shape_cast %175 : vector<64xf32> to vector<1x64xf32>
    %cst_64 = arith.constant 0.000000e+00 : f32
    %177 = vector.broadcast %cst_64 : f32 to vector<1x64xf32>
    %cst_65 = arith.constant 0.000000e+00 : f32
    %178 = vector.broadcast %cst_65 : f32 to vector<1x64xf32>
    %179 = arith.mulf %173, %20 : vector<1x64xf32>
    %cst_66 = arith.constant dense<0.000000e+00> : vector<1xf32>
    %180 = vector.multi_reduction <add>, %179, %cst_66 [1] : vector<1x64xf32> to vector<1xf32>
    %181 = vector.shape_cast %180 : vector<1xf32> to vector<1x1xf32>
    %182 = arith.mulf %176, %20 : vector<1x64xf32>
    %cst_67 = arith.constant dense<0.000000e+00> : vector<1xf32>
    %183 = vector.multi_reduction <add>, %182, %cst_67 [1] : vector<1x64xf32> to vector<1xf32>
    %184 = vector.shape_cast %183 : vector<1xf32> to vector<1x1xf32>
    %cst_68 = arith.constant 0.001953125 : f32
    %185 = vector.broadcast %cst_68 : f32 to vector<1x1xf32>
    %186 = arith.mulf %181, %185 : vector<1x1xf32>
    %cst_69 = arith.constant 0.001953125 : f32
    %187 = vector.broadcast %cst_69 : f32 to vector<1x1xf32>
    %188 = arith.mulf %184, %187 : vector<1x1xf32>
    %189 = arith.mulf %186, %186 : vector<1x1xf32>
    %190 = arith.subf %188, %189 : vector<1x1xf32>
    %191 = vector.broadcast %186 : vector<1x1xf32> to vector<1x64xf32>
    %192 = arith.mulf %191, %20 : vector<1x64xf32>
    %193 = arith.addf %177, %192 : vector<1x64xf32>
    %194 = vector.broadcast %190 : vector<1x1xf32> to vector<1x64xf32>
    %195 = arith.mulf %194, %20 : vector<1x64xf32>
    %196 = arith.addf %178, %195 : vector<1x64xf32>
    %197 = arith.mulf %173, %24 : vector<1x64xf32>
    %cst_70 = arith.constant dense<0.000000e+00> : vector<1xf32>
    %198 = vector.multi_reduction <add>, %197, %cst_70 [1] : vector<1x64xf32> to vector<1xf32>
    %199 = vector.shape_cast %198 : vector<1xf32> to vector<1x1xf32>
    %200 = arith.mulf %176, %24 : vector<1x64xf32>
    %cst_71 = arith.constant dense<0.000000e+00> : vector<1xf32>
    %201 = vector.multi_reduction <add>, %200, %cst_71 [1] : vector<1x64xf32> to vector<1xf32>
    %202 = vector.shape_cast %201 : vector<1xf32> to vector<1x1xf32>
    %cst_72 = arith.constant 0.001953125 : f32
    %203 = vector.broadcast %cst_72 : f32 to vector<1x1xf32>
    %204 = arith.mulf %199, %203 : vector<1x1xf32>
    %cst_73 = arith.constant 0.001953125 : f32
    %205 = vector.broadcast %cst_73 : f32 to vector<1x1xf32>
    %206 = arith.mulf %202, %205 : vector<1x1xf32>
    %207 = arith.mulf %204, %204 : vector<1x1xf32>
    %208 = arith.subf %206, %207 : vector<1x1xf32>
    %209 = vector.broadcast %204 : vector<1x1xf32> to vector<1x64xf32>
    %210 = arith.mulf %209, %24 : vector<1x64xf32>
    %211 = arith.addf %193, %210 : vector<1x64xf32>
    %212 = vector.broadcast %208 : vector<1x1xf32> to vector<1x64xf32>
    %213 = arith.mulf %212, %24 : vector<1x64xf32>
    %214 = arith.addf %196, %213 : vector<1x64xf32>
    %215 = arith.mulf %173, %28 : vector<1x64xf32>
    %cst_74 = arith.constant dense<0.000000e+00> : vector<1xf32>
    %216 = vector.multi_reduction <add>, %215, %cst_74 [1] : vector<1x64xf32> to vector<1xf32>
    %217 = vector.shape_cast %216 : vector<1xf32> to vector<1x1xf32>
    %218 = arith.mulf %176, %28 : vector<1x64xf32>
    %cst_75 = arith.constant dense<0.000000e+00> : vector<1xf32>
    %219 = vector.multi_reduction <add>, %218, %cst_75 [1] : vector<1x64xf32> to vector<1xf32>
    %220 = vector.shape_cast %219 : vector<1xf32> to vector<1x1xf32>
    %cst_76 = arith.constant 0.001953125 : f32
    %221 = vector.broadcast %cst_76 : f32 to vector<1x1xf32>
    %222 = arith.mulf %217, %221 : vector<1x1xf32>
    %cst_77 = arith.constant 0.001953125 : f32
    %223 = vector.broadcast %cst_77 : f32 to vector<1x1xf32>
    %224 = arith.mulf %220, %223 : vector<1x1xf32>
    %225 = arith.mulf %222, %222 : vector<1x1xf32>
    %226 = arith.subf %224, %225 : vector<1x1xf32>
    %227 = vector.broadcast %222 : vector<1x1xf32> to vector<1x64xf32>
    %228 = arith.mulf %227, %28 : vector<1x64xf32>
    %229 = arith.addf %211, %228 : vector<1x64xf32>
    %230 = vector.broadcast %226 : vector<1x1xf32> to vector<1x64xf32>
    %231 = arith.mulf %230, %28 : vector<1x64xf32>
    %232 = arith.addf %214, %231 : vector<1x64xf32>
    %233 = arith.mulf %173, %32 : vector<1x64xf32>
    %cst_78 = arith.constant dense<0.000000e+00> : vector<1xf32>
    %234 = vector.multi_reduction <add>, %233, %cst_78 [1] : vector<1x64xf32> to vector<1xf32>
    %235 = vector.shape_cast %234 : vector<1xf32> to vector<1x1xf32>
    %236 = arith.mulf %176, %32 : vector<1x64xf32>
    %cst_79 = arith.constant dense<0.000000e+00> : vector<1xf32>
    %237 = vector.multi_reduction <add>, %236, %cst_79 [1] : vector<1x64xf32> to vector<1xf32>
    %238 = vector.shape_cast %237 : vector<1xf32> to vector<1x1xf32>
    %cst_80 = arith.constant 0.001953125 : f32
    %239 = vector.broadcast %cst_80 : f32 to vector<1x1xf32>
    %240 = arith.mulf %235, %239 : vector<1x1xf32>
    %cst_81 = arith.constant 0.001953125 : f32
    %241 = vector.broadcast %cst_81 : f32 to vector<1x1xf32>
    %242 = arith.mulf %238, %241 : vector<1x1xf32>
    %243 = arith.mulf %240, %240 : vector<1x1xf32>
    %244 = arith.subf %242, %243 : vector<1x1xf32>
    %245 = vector.broadcast %240 : vector<1x1xf32> to vector<1x64xf32>
    %246 = arith.mulf %245, %32 : vector<1x64xf32>
    %247 = arith.addf %229, %246 : vector<1x64xf32>
    %248 = vector.broadcast %244 : vector<1x1xf32> to vector<1x64xf32>
    %249 = arith.mulf %248, %32 : vector<1x64xf32>
    %250 = arith.addf %232, %249 : vector<1x64xf32>
    %cst_82 = arith.constant 9.99999974E-6 : f32
    %251 = vector.broadcast %cst_82 : f32 to vector<1x64xf32>
    %252 = arith.addf %250, %251 : vector<1x64xf32>
    %253 = math.rsqrt %252 : vector<1x64xf32>
    %254 = arith.mulf %170, %253 : vector<1x64xf32>
    %255 = arith.mulf %247, %254 : vector<1x64xf32>
    %256 = arith.subf %171, %255 : vector<1x64xf32>
    %257 = vector.broadcast %254 : vector<1x64xf32> to vector<32x64xf32>
    %258 = arith.mulf %169, %257 : vector<32x64xf32>
    %259 = vector.broadcast %256 : vector<1x64xf32> to vector<32x64xf32>
    %260 = arith.addf %258, %259 : vector<32x64xf32>
    %261 = vector.shape_cast %33 : vector<2x16x64xf32> to vector<32x64xf32>
    %262 = arith.addf %260, %261 : vector<32x64xf32>
    %cst_83 = arith.constant 0.000000e+00 : f32
    %263 = vector.broadcast %cst_83 : f32 to vector<32x64xf32>
    %264 = arith.maximumf %262, %263 : vector<32x64xf32>
    %c0_84 = arith.constant 0 : index
    %c0_85 = arith.constant 0 : index
    %265 = vector.load %arg7[%c0_84, %c0_85] : memref<32x64xf32, #tpu.memory_space<vmem>>, vector<32x64xf32>
    tpu.vector_store %arg7[%c0_84, %c0_85], %264 {strides = array<i32>} : memref<32x64xf32, #tpu.memory_space<vmem>>, vector<32x64xf32>,
    return
  }
}

</mosaic_0001>

<bundles_post_ra>
// kernel: tpu_custom_call.1
= control target key start
LH: loop header
LB: loop body
LE: loop exit
PB: predicated region body
PF: predicated region fallthrough
CT: control target
= control target key end

     0   :  { %12 = vsyncpa [#allocation3], 0  ;;  %s1715_s0 = inlined_call_operand.hbm [shape: f32[2,16,64], index: 0, kind: input, shape index: {}]   ;;  %s1716_s1 = inlined_call_operand.hbm [shape: f32[3,64,64], index: 1, kind: input, shape index: {}]   ;;  %s1717_s2 = inlined_call_operand.hbm [shape: f32[3,64,64], index: 2, kind: input, shape index: {}]   ;;  %s1718_s3 = inlined_call_operand.vmem [shape: f32[1,64], index: 3, kind: input, shape index: {}]   ;;  %s1719_s4 = inlined_call_operand.vmem [shape: f32[1,64], index: 4, kind: input, shape index: {}]   ;;  %s1720_s5 = inlined_call_operand.vmem [shape: f32[1,64], index: 5, kind: input, shape index: {}]   ;;  %s1721_s6 = inlined_call_operand.vmem [shape: f32[1,64], index: 6, kind: input, shape index: {}]   ;;  %s1722_s7 = inlined_call_operand.hbm [shape: f32[32,64], index: 7, kind: output, shape index: {}]  }
   0x1   :  { %13 = vsyncpa [#allocation6], 0 }
   0x2   :  { %14 = vsyncpa [#allocation4], 0  ;;  %s1409_s24 = smov [#allocation5]   ;;  %s1410_s26 = smov [#allocation2]  }
   0x3   :  { %s32_s25 = sshll.u32 %s1409_s24, 4  ;;  %s20_s27 = sshll.u32 %s1410_s26, 4  ;;  %s33_s25 = int_to_ptr.vmem [resolvable:$true] %s32_s25  ;;  %s21_s27 = int_to_ptr.vmem [resolvable:$true] %s20_s27 }
   0x4   :  { %s1331_s28 = scalar_lea.vmem %s33_s25, 3072  ;;  %p1336_p1 = scmp.lt.s32.totalorder %s33_s25, %s33_s25 }
   0x5   :  { %p1332_p0 = scmp.ne.s32.totalorder %s33_s25, %s1331_s28  ;;  %p1337_p2 = scmp.lt.s32.totalorder %s1331_s28, %s1331_s28 }
   0x7   :  { %p1338_p3 = por %p1337_p2, %p1336_p1 }
   0x9   :  { %p1339_p4 = pnand %p1338_p3, %p1332_p0 }
   0xb   :  { %1342 = shalt.err (!%p1339_p4)
}
   0xc   :  { %s1411_s29 = smov 128   ;;  %s1412_s30 = smov 8  }
   0xd   :  { %38 = dma.hbm_to_vmem [thread:$0]  %s1716_s1, 3072, %s33_s25, [#allocation6], %s1411_s29, %s1411_s29, %s1412_s30  }
   0xe   :  { %s1351_s10 = scalar_lea.vmem %s21_s27, 512  ;;  %p1356_p6 = scmp.lt.s32.totalorder %s21_s27, %s21_s27 }
   0xf   :  { %p1352_p5 = scmp.ne.s32.totalorder %s21_s27, %s1351_s10  ;;  %p1357_p7 = scmp.lt.s32.totalorder %s1351_s10, %s1351_s10 }
  0x11   :  { %p1358_p8 = por %p1357_p7, %p1356_p6 }
  0x13   :  { %p1359_p9 = pnand %p1358_p8, %p1352_p5 }
  0x15   :  { %1362 = shalt.err (!%p1359_p9)
}
  0x16   :  { %26 = dma.hbm_to_vmem [thread:$0]  %s1715_s0, 512, %s21_s27, [#allocation3], %s1411_s29, %s1411_s29, %s1412_s30  }
  0x17   :  { %s1413_s13 = smov [#allocation7]  }
  0x18   :  { %s44_s14 = sshll.u32 %s1413_s13, 4  ;;  %s45_s14 = int_to_ptr.vmem [resolvable:$true] %s44_s14 }
  0x19   :  { %s1371_s15 = scalar_lea.vmem %s45_s14, 3072  ;;  %p1376_p11 = scmp.lt.s32.totalorder %s45_s14, %s45_s14 }
  0x1a   :  { %p1372_p10 = scmp.ne.s32.totalorder %s45_s14, %s1371_s15  ;;  %p1377_p12 = scmp.lt.s32.totalorder %s1371_s15, %s1371_s15 }
  0x1c   :  { %p1378_p13 = por %p1377_p12, %p1376_p11 }
  0x1e   :  { %p1379_p0 = pnand %p1378_p13, %p1372_p10 }
  0x20   :  { %1382 = shalt.err (!%p1379_p0)
}
  0x21   :  { %50 = dma.hbm_to_vmem [thread:$0]  %s1717_s2, 3072, %s45_s14, [#allocation6], %s1411_s29, %s1411_s29, %s1412_s30  }
  0x22   :  { %1403 = dma.done.wait [#allocation3], 512  }
  0x23   :  { %1404 = vsyncadd [#allocation3], 4294966784 }
  0x24   :  { %1405 = dma.done.wait [#allocation6], 6144  }
  0x25   :  { %1406 = vsyncadd [#allocation6], 4294961152  ;;  %v148_v0 = vld [vmem:[#allocation5 + $0x78] sm:$0xff]  ;;  %v147_v2 = vld [vmem:[#allocation5 + $0x70] sm:$0xff]  ;;  %vm102_vm0 = vcmask 1040384   ;;  %vm129_vm1 = vcmask 1046528  }
  0x26   :  { %v124_v1 = vld [vmem:[#allocation5 + $0x38] sm:$0xff]  ;;  %1180 = vmatprep.subr.mxu0 %v148_v0  ;;  %v123_v3 = vld [vmem:[#allocation5 + $0x30] sm:$0xff]  ;;  %v146_v4 = vld [vmem:[#allocation5 + $0x68] sm:$0xff]  ;;  %vm149_vm2 = vcmask 523264   ;;  %vm336_vm3 = vcmask 1045504  }
  0x27   :  { %1202 = vmatprep.subr.mxu1 %v124_v1  ;;  %1181 = vmatpush3.msra.mxu0 %v148_v0  ;;  %v122_v5 = vld [vmem:[#allocation5 + $0x28] sm:$0xff]  ;;  %v145_v6 = vld [vmem:[#allocation5 + $0x60] sm:$0xff]  ;;  %v144_v10 = vld [vmem:[#allocation5 + $0x58] sm:$0xff] }
  0x28   :  { %1203 = vmatpush3.msra.mxu1 %v124_v1  ;;  %1182 = vmatprep.subr.mxu0 %v147_v2  ;;  %v121_v7 = vld [vmem:[#allocation5 + $0x20] sm:$0xff]  ;;  %v1476_v9 = vld [vmem:[#allocation2 + $0x8] sm:$0xff]  ;;  %v120_v11 = vld [vmem:[#allocation5 + $0x18] sm:$0xff] }
  0x29   :  { %1204 = vmatprep.subr.mxu1 %v123_v3  ;;  %1183 = vmatpush3.msra.mxu0 %v147_v2  ;;  %v1474_v8 = vld [vmem:[#allocation2] sm:$0xff]  ;;  %v104_v13 = vrot.slane %v1476_v9, 7  ;;  %v1480_v14 = vld [vmem:[#allocation2 + $0x10] sm:$0xff]  ;;  %v1489_v20 = vld [vmem:[#allocation2 + $0x18] sm:$0xff] }
  0x2a   :  { %1205 = vmatpush3.msra.mxu1 %v123_v3  ;;  %1184 = vmatprep.subr.mxu0 %v146_v4  ;;  %v103_v12 = vrot.slane %v1474_v8, 7  ;;  %v143_v15 = vld [vmem:[#allocation5 + $0x50] sm:$0xff]  ;;  %v106_v21 = vrot.slane %v1480_v14, 7  ;;  %v142_v24 = vld [vmem:[#allocation5 + $0x48] sm:$0xff]  ;;  %v107_v26 = vrot.slane %v1489_v20, 7  ;;  %v141_v29 = vld [vmem:[#allocation5 + $0x40] sm:$0xff] }
  0x2b   :  { %1206 = vmatprep.subr.mxu1 %v122_v5  ;;  %1185 = vmatpush3.msra.mxu0 %v146_v4  ;;  %v119_v16 = vld [vmem:[#allocation5 + $0x10] sm:$0xff]  ;;  %v1487_v19 = vsel %vm102_vm0, %v104_v13, 0.0  ;;  %v118_v25 = vld [vmem:[#allocation5 + $0x8] sm:$0xff]  ;;  %v117_v30 = vld [vmem:[#allocation5] sm:$0xff] }
  0x2c   :  { %1207 = vmatpush3.msra.mxu1 %v122_v5  ;;  %1186 = vmatprep.subr.mxu0 %v145_v6  ;;  %v1483_v17 = vsel %vm102_vm0, %v103_v12, %v104_v13  ;;  %v113_v18 = vsel %vm102_vm0, 0.0, %v103_v12  ;;  %v1495_v27 = vsel %vm102_vm0, 0.0, %v106_v21  ;;  %v133_v28 = vrot.slane %v1487_v19, 1  ;;  %v355_v37 = vld [vmem:[#allocation5 + $0xb8] sm:$0xff]  ;;  %v354_v42 = vld [vmem:[#allocation5 + $0xb0] sm:$0xff]  ;;  %v353_v43 = vld [vmem:[#allocation5 + $0xa8] sm:$0xff] }
  0x2d   :  { %1208 = vmatprep.subr.mxu1 %v121_v7  ;;  %1187 = vmatpush3.msra.mxu0 %v145_v6  ;;  %v130_v22 = vrot.slane %v113_v18, 1  ;;  %v131_v23 = vrot.slane %v1483_v17, 1  ;;  %v1499_v31 = vsel %vm102_vm0, %v106_v21, %v107_v26  ;;  %v135_v32 = vrot.slane %v1495_v27, 1  ;;  %v352_v46 = vld [vmem:[#allocation5 + $0xa0] sm:$0xff]  ;;  %v351_v47 = vld [vmem:[#allocation5 + $0x98] sm:$0xff]  ;;  %v350_v48 = vld [vmem:[#allocation5 + $0x90] sm:$0xff] }
  0x2e   :  { %1209 = vmatpush3.msra.mxu1 %v121_v7  ;;  %1188 = vmatprep.subr.mxu0 %v144_v10  ;;  %v136_v34 = vrot.slane %v1499_v31, 1  ;;  %v116_v35 = vsel %vm102_vm0, %v107_v26, 0.0  ;;  %v337_v40 = vrot.slane %v113_v18, 2  ;;  %v338_v41 = vrot.slane %v1483_v17, 2  ;;  %v349_v50 = vld [vmem:[#allocation5 + $0x88] sm:$0xff]  ;;  %v348_v53 = vld [vmem:[#allocation5 + $0x80] sm:$0xff] }
  0x2f   :  { %1210 = vmatprep.subr.mxu1 %v120_v11  ;;  %1189 = vmatpush3.msra.mxu0 %v144_v10  ;;  %v132_v33 = vsel %vm129_vm1, %v130_v22, %v131_v23  ;;  %v134_v36 = vsel %vm129_vm1, %v131_v23, %v133_v28  ;;  %v138_v39 = vrot.slane %v116_v35, 1  ;;  %v340_v49 = vrot.slane %v1487_v19, 2 }
  0x30   :  { %1211 = vmatpush3.msra.mxu1 %v120_v11  ;;  %1190 = vmatprep.subr.mxu0 %v143_v15  ;;  %v137_v38 = vsel %vm129_vm1, %v135_v32, %v136_v34  ;;  %v339_v45 = vsel %vm336_vm3, %v337_v40, %v338_v41  ;;  %v342_v51 = vrot.slane %v1495_v27, 2  ;;  %v343_v52 = vrot.slane %v1499_v31, 2 }
  0x31   :  { %1212 = vmatprep.subr.mxu1 %v119_v16  ;;  %1191 = vmatpush3.msra.mxu0 %v143_v15  ;;  %v139_v44 = vsel %vm129_vm1, %v136_v34, %v138_v39  ;;  %v341_v54 = vsel %vm336_vm3, %v338_v41, %v340_v49  ;;  %v345_v55 = vrot.slane %v116_v35, 2 }
  0x32   :  { %1213 = vmatpush3.msra.mxu1 %v119_v16  ;;  %1192 = vmatprep.subr.mxu0 %v142_v24  ;;  %v344_v56 = vsel %vm336_vm3, %v342_v51, %v343_v52 }
  0x33   :  { %1214 = vmatprep.subr.mxu1 %v118_v25  ;;  %1193 = vmatpush3.msra.mxu0 %v142_v24  ;;  %v346_v57 = vsel %vm336_vm3, %v343_v52, %v345_v55  ;;  %v68_v24 = vlaneseq }
  0x34   :  { %1215 = vmatpush3.msra.mxu1 %v118_v25  ;;  %1194 = vmatprep.subr.mxu0 %v141_v29 }
  0x35   :  { %1216 = vmatprep.subr.mxu1 %v117_v30  ;;  %1195 = vmatpush3.msra.mxu0 %v141_v29  ;;  %v69_v35 = vand.u32 127, %v68_v24 }
  0x36   :  { %1196 = vmatprep.mubr.msk.f32.mxu0 %vm149_vm2, %v132_v33  ;;  %1217 = vmatpush3.msra.mxu1 %v117_v30 }
  0x37   :  { %1218 = vmatprep.mubr.msk.f32.mxu1 %vm149_vm2, %v113_v18  ;;  %1197 = vmatmul.mubr.msk.f32.vlgmr.msra.gmra.mxu0 %vm149_vm2, %v134_v36  ;;  %v74_v41 = vand.u32 3, %v69_v35 }
  0x38   :  { %1219 = vmatmul.mubr.msk.f32.vlgmr.msra.gmra.mxu1 %vm149_vm2, %v1483_v17  ;;  %1224 = vmatprep.subr.mxu0 %v355_v37 }
  0x39   :  { %1199 = vmatprep.mubr.msk.f32.mxu0 %vm149_vm2, %v137_v38  ;;  %1225 = vmatpush3.msra.mxu0 %v355_v37  ;;  %vm82_vm4 = vcmp.eq.s32.totalorder %v74_v41, 0  ;;  %vm85_vm5 = vcmp.eq.s32.totalorder %v74_v41, 1  ;;  %vm88_vm6 = vcmp.eq.s32.totalorder %v74_v41, 2  ;;  %vm91_vm7 = vcmp.eq.s32.totalorder %v74_v41, 3 }
  0x3a   :  { %1221 = vmatprep.mubr.msk.f32.mxu1 %vm149_vm2, %v1495_v27  ;;  %1226 = vmatprep.subr.mxu0 %v354_v42 }
  0x3b   :  { %1227 = vmatpush3.msra.mxu0 %v354_v42 }
  0x3c   :  { %1222 = vmatmul.mubr.msk.f32.gmra.mxu1 %vm149_vm2, %v1499_v31  ;;  %1228 = vmatprep.subr.mxu0 %v353_v43 }
  0x3d   :  { %1200 = vmatmul.mubr.msk.f32.gmra.mxu0 %vm149_vm2, %v139_v44 }
  0x3e   :  { %1229 = vmatpush3.msra.mxu0 %v353_v43  ;;  %1240 = vmatprep.mubr.msk.f32.mxu0 %vm149_vm2, %v339_v45 }
  0x3f   :  { %1230 = vmatprep.subr.mxu0 %v352_v46 }
  0x40   :  { %1231 = vmatpush3.msra.mxu0 %v352_v46 }
  0x41   :  { %1232 = vmatprep.subr.mxu0 %v351_v47 }
  0x42   :  { %1233 = vmatpush3.msra.mxu0 %v351_v47 }
  0x43   :  { %1234 = vmatprep.subr.mxu0 %v350_v48 }
  0x44   :  { %1235 = vmatpush3.msra.mxu0 %v350_v48  ;;  %v1414_v48 = vmov 0.0  }
  0x45   :  { %1236 = vmatprep.subr.mxu0 %v349_v50  ;;  %v1560_v49 = vsel %vm82_vm4, 1.0, %v1414_v48  ;;  %v1562_v52 = vsel %vm85_vm5, 1.0, %v1414_v48 }
  0x46   :  { %1237 = vmatpush3.msra.mxu0 %v349_v50 }
  0x47   :  { %1238 = vmatprep.subr.mxu0 %v348_v53 }
  0x48   :  { %1239 = vmatpush3.msra.mxu0 %v348_v53 }
  0x49   :  { %1241 = vmatmul.mubr.msk.f32.vlgmr.msra.gmra.mxu0 %vm149_vm2, %v341_v54 }
  0x4a   :  { %1243 = vmatprep.mubr.msk.f32.mxu0 %vm149_vm2, %v344_v56 }
  0x4d   :  { %1244 = vmatmul.mubr.msk.f32.gmra.mxu0 %vm149_vm2, %v346_v57 }
  0xf7   :  { %v1198_v58 = vpop.f32.mrf.mxu0 }
  0xf8   :  { %v1220_v59 = vpop.f32.mrf.mxu1 }
  0xf9   :  { %v224_v60 = vpop.f32.mrf.mxu0  ;;  %v323_v1 = vadd.f32 %v1220_v59, %v1198_v58  ;;  %v1568_v58 = vsel %vm88_vm6, 1.0, %v1414_v48 }
  0xfa   :  { %v317_v62 = vpop.f32.mrf.mxu1 }
  0xfb   :  { %v318_v3 = vadd.f32 %v317_v62, %v224_v60 }
  0xfc   :  { %v1223_v63 = vpop.f32.mrf.mxu1 }
  0xfd   :  { %v1201_v61 = vpop.f32.mrf.mxu0 }
  0xfe   :  { %v327_v4 = vpop.f32.mrf.mxu1  ;;  %v333_v7 = vadd.f32 %v1223_v63, %v1201_v61  ;;  %v1574_v63 = vsel %vm91_vm7, 1.0, %v1414_v48 }
  0xff   :  { %v234_v0 = vpop.f32.mrf.mxu0 }
 0x100   :  { %v328_v11 = vadd.f32 %v327_v4, %v234_v0 }
 0x109   :  { %v1242_v2 = vpop.f32.mrf.mxu0 }
 0x10a   :  { %v1531_v5 = vadd.f32 %v1242_v2, %v323_v1 }
 0x10b   :  { %v430_v6 = vpop.f32.mrf.mxu0 }
 0x10c   :  { %v1533_v10 = vadd.f32 %v430_v6, %v318_v3  ;;  %v469_v13 = vmul.f32 %v1531_v5, %v1531_v5  ;;  %v456_v19 = vsel %vm149_vm2, %v1531_v5, 0.0 }
 0x10d   :  { %v1245_v12 = vpop.f32.mrf.mxu0 }
 0x10e   :  { %v455_v15 = vsel %vm149_vm2, %v1533_v10, 0.0  ;;  %v468_v16 = vmul.f32 %v1533_v10, %v1533_v10  ;;  %v1541_v17 = vadd.f32 %v1245_v12, %v333_v7  ;;  %v473_v25 = vsel %vm149_vm2, %v469_v13, 0.0  ;;  %v603_v12 = vld [vmem:[#allocation7 + $0x38] sm:$0xff] }
 0x10f   :  { %v440_v18 = vpop.f32.mrf.mxu0  ;;  %v457_v23 = vadd.f32 %v456_v19, %v455_v15  ;;  %v626_v13 = vld [vmem:[#allocation7 + $0x78] sm:$0xff]  ;;  %v602_v15 = vld [vmem:[#allocation7 + $0x30] sm:$0xff]  ;;  %1268 = vmatprep.subr.mxu0 %v603_v12  ;;  %v624_v19 = vld [vmem:[#allocation7 + $0x68] sm:$0xff] }
 0x110   :  { %v472_v21 = vsel %vm149_vm2, %v468_v16, 0.0  ;;  %v1546_v22 = vadd.f32 %v440_v18, %v328_v11  ;;  %v471_v26 = vmul.f32 %v1541_v17, %v1541_v17  ;;  %v460_v31 = vsel %vm149_vm2, %v1541_v17, 0.0  ;;  %1246 = vmatprep.subr.mxu1 %v626_v13  ;;  %v625_v16 = vld [vmem:[#allocation7 + $0x70] sm:$0xff]  ;;  %1269 = vmatpush3.msra.mxu0 %v603_v12  ;;  %v601_v18 = vld [vmem:[#allocation7 + $0x28] sm:$0xff] }
 0x111   :  { %v474_v29 = vadd.f32 %v473_v25, %v472_v21  ;;  %1247 = vmatpush3.msra.mxu1 %v626_v13  ;;  %1270 = vmatprep.subr.mxu0 %v602_v15  ;;  %v600_v21 = vld [vmem:[#allocation7 + $0x20] sm:$0xff]  ;;  %v599_v25 = vld [vmem:[#allocation7 + $0x18] sm:$0xff]  ;;  %v556_v13 = vshrl.u32 %v68_v24, 7 }
 0x112   :  { %v458_v27 = vsel %vm149_vm2, %v1546_v22, 0.0  ;;  %v470_v28 = vmul.f32 %v1546_v22, %v1546_v22  ;;  %v477_v36 = vsel %vm149_vm2, %v471_v26, 0.0  ;;  %1248 = vmatprep.subr.mxu1 %v625_v16  ;;  %1271 = vmatpush3.msra.mxu0 %v602_v15  ;;  %v622_v26 = vld [vmem:[#allocation7 + $0x58] sm:$0xff] }
 0x113   :  { %v459_v30 = vadd.f32 %v458_v27, %v457_v23  ;;  %1249 = vmatpush3.msra.mxu1 %v625_v16  ;;  %v623_v23 = vld [vmem:[#allocation7 + $0x60] sm:$0xff]  ;;  %1272 = vmatprep.subr.mxu0 %v601_v18  ;;  %v598_v27 = vld [vmem:[#allocation7 + $0x10] sm:$0xff] }
 0x114   :  { %v475_v32 = vsel %vm149_vm2, %v470_v28, 0.0  ;;  %1250 = vmatprep.subr.mxu1 %v624_v19  ;;  %1273 = vmatpush3.msra.mxu0 %v601_v18  ;;  %v621_v28 = vld [vmem:[#allocation7 + $0x50] sm:$0xff]  ;;  %v453_v18 = vld [vmem:[%s1718_s3] sm:$0x1] }
 0x115   :  { %v461_v33 = vadd.f32 %v460_v31, %v459_v30  ;;  %v476_v34 = vadd.f32 %v475_v32, %v474_v29  ;;  %1251 = vmatpush3.msra.mxu1 %v624_v19  ;;  %1274 = vmatprep.subr.mxu0 %v600_v21  ;;  %v597_v29 = vld [vmem:[#allocation7 + $0x8] sm:$0xff]  ;;  %v596_v31 = vld [vmem:[#allocation7] sm:$0xff] }
 0x116   :  { %1252 = vmatprep.subr.mxu1 %v623_v23  ;;  %1275 = vmatpush3.msra.mxu0 %v600_v21  ;;  %v620_v30 = vld [vmem:[#allocation7 + $0x48] sm:$0xff]  ;;  %v619_v32 = vld [vmem:[#allocation7 + $0x40] sm:$0xff]  ;;  %v1599_v21 = vsub.s32 0, %v556_v13 }
 0x117   :  { %v462_v37 = vrot.slane %v461_v33, 4  ;;  %v478_v38 = vadd.f32 %v477_v36, %v476_v34  ;;  %1253 = vmatpush3.msra.mxu1 %v623_v23  ;;  %1276 = vmatprep.subr.mxu0 %v599_v25 }
 0x118   :  { %1254 = vmatprep.subr.mxu1 %v622_v26  ;;  %1277 = vmatpush3.msra.mxu0 %v599_v25 }
 0x119   :  { %v463_v39 = vadd.f32 %v462_v37, %v461_v33  ;;  %v479_v40 = vrot.slane %v478_v38, 4  ;;  %1255 = vmatpush3.msra.mxu1 %v622_v26  ;;  %1278 = vmatprep.subr.mxu0 %v598_v27  ;;  %v1584_v33 = vld [vmem:[#allocation7 + $0xb8] sm:$0xff] }
 0x11a   :  { %1256 = vmatprep.subr.mxu1 %v621_v28  ;;  %1279 = vmatpush3.msra.mxu0 %v598_v27  ;;  %v454_v27 = vld [vmem:[%s1719_s4] sm:$0x1] }
 0x11b   :  { %v464_v42 = vrot.slane %v463_v39, 2  ;;  %v480_v43 = vadd.f32 %v479_v40, %v478_v38  ;;  %1257 = vmatpush3.msra.mxu1 %v621_v28  ;;  %1280 = vmatprep.subr.mxu0 %v597_v29 }
 0x11c   :  { %1258 = vmatprep.subr.mxu1 %v620_v30  ;;  %1281 = vmatpush3.msra.mxu0 %v597_v29 }
 0x11d   :  { %v465_v44 = vadd.f32 %v464_v42, %v463_v39  ;;  %v481_v45 = vrot.slane %v480_v43, 2  ;;  %1259 = vmatpush3.msra.mxu1 %v620_v30  ;;  %1282 = vmatprep.subr.mxu0 %v596_v31 }
 0x11e   :  { %1283 = vmatpush3.msra.mxu0 %v596_v31  ;;  %1260 = vmatprep.subr.mxu1 %v619_v32 }
 0x11f   :  { %v466_v46 = vrot.slane %v465_v44, 1  ;;  %v482_v47 = vadd.f32 %v481_v45, %v480_v43  ;;  %1261 = vmatpush3.msra.mxu1 %v619_v32 }
 0x120   :  { %1290 = vmatprep.subr.mxu1 %v1584_v33 }
 0x121   :  { %v467_v50 = vadd.f32 %v466_v46, %v465_v44  ;;  %v483_v51 = vrot.slane %v482_v47, 1 }
 0x123   :  { %v485_v53 = vmul.f32 %v1560_v49, %v467_v50  ;;  %v484_v54 = vadd.f32 %v483_v51, %v482_v47  ;;  %v501_v57 = vmul.f32 %v1562_v52, %v467_v50  ;;  %v517_v62 = vmul.f32 %v1568_v58, %v467_v50 }
 0x124   :  { %v533_v3 = vmul.f32 %v1574_v63, %v467_v50 }
 0x125   :  { %v486_v55 = vsel %vm149_vm2, %v485_v53, 0.0  ;;  %v489_v56 = vmul.f32 %v1560_v49, %v484_v54  ;;  %v505_v60 = vmul.f32 %v1562_v52, %v484_v54  ;;  %v502_v61 = vsel %vm149_vm2, %v501_v57, 0.0 }
 0x126   :  { %487 = vadd.xlane.f32.xlu0 %v486_v55  ;;  %v521_v1 = vmul.f32 %v1568_v58, %v484_v54  ;;  %v518_v2 = vsel %vm149_vm2, %v517_v62, 0.0  ;;  %v537_v6 = vmul.f32 %v1574_v63, %v484_v54  ;;  %v534_v7 = vsel %vm149_vm2, %v533_v3, 0.0 }
 0x127   :  { %v490_v59 = vsel %vm149_vm2, %v489_v56, 0.0  ;;  %v506_v0 = vsel %vm149_vm2, %v505_v60, 0.0 }
 0x128   :  { %491 = vadd.xlane.f32.xlu1 %v490_v59  ;;  %v522_v4 = vsel %vm149_vm2, %v521_v1, 0.0  ;;  %v538_v11 = vsel %vm149_vm2, %v537_v6, 0.0 }
 0x12a   :  { %503 = vadd.xlane.f32.xlu0 %v502_v61 }
 0x12c   :  { %507 = vadd.xlane.f32.xlu1 %v506_v0 }
 0x12e   :  { %519 = vadd.xlane.f32.xlu0 %v518_v2 }
 0x130   :  { %523 = vadd.xlane.f32.xlu1 %v522_v4 }
 0x132   :  { %535 = vadd.xlane.f32.xlu0 %v534_v7 }
 0x134   :  { %539 = vadd.xlane.f32.xlu1 %v538_v11 }
 0x1af   :  { %v488_v34 = vpop.xlane.xlu0 %487 }
 0x1b0   :  { %v493_v36 = vmul.f32 0.001953125, %v488_v34 }
 0x1b1   :  { %v492_v35 = vpop.xlane.xlu1 %491 }
 0x1b2   :  { %v495_v40 = vmul.f32 %v493_v36, %v493_v36  ;;  %v494_v41 = vmul.f32 0.001953125, %v492_v35  ;;  %v497_v11 = vmul.f32 %v1560_v49, %v493_v36 }
 0x1b3   :  { %v504_v37 = vpop.xlane.xlu0 %503 }
 0x1b4   :  { %v509_v38 = vmul.f32 0.001953125, %v504_v37  ;;  %v496_v48 = vsub.f32 %v494_v41, %v495_v40 }
 0x1b5   :  { %v508_v39 = vpop.xlane.xlu1 %507 }
 0x1b6   :  { %v511_v42 = vmul.f32 %v509_v38, %v509_v38  ;;  %v510_v43 = vmul.f32 0.001953125, %v508_v39  ;;  %v499_v59 = vmul.f32 %v1560_v49, %v496_v48  ;;  %v513_v7 = vmul.f32 %v1562_v52, %v509_v38 }
 0x1b7   :  { %v520_v44 = vpop.xlane.xlu0 %519 }
 0x1b8   :  { %v512_v45 = vsub.f32 %v510_v43, %v511_v42  ;;  %v525_v46 = vmul.f32 0.001953125, %v520_v44  ;;  %v514_v15 = vadd.f32 %v513_v7, %v497_v11  ;;  %v827_v7 = vld [vmem:[#allocation7 + $0x98] sm:$0xff]  ;;  %v825_v11 = vld [vmem:[#allocation7 + $0x88] sm:$0xff] }
 0x1b9   :  { %v524_v47 = vpop.xlane.xlu1 %523 }
 0x1ba   :  { %v527_v50 = vmul.f32 %v525_v46, %v525_v46  ;;  %v526_v51 = vmul.f32 0.001953125, %v524_v47  ;;  %v515_v54 = vmul.f32 %v1562_v52, %v512_v45  ;;  %v529_v12 = vmul.f32 %v1568_v58, %v525_v46 }
 0x1bb   :  { %v536_v53 = vpop.xlane.xlu0 %535 }
 0x1bc   :  { %v528_v55 = vsub.f32 %v526_v51, %v527_v50  ;;  %v541_v56 = vmul.f32 0.001953125, %v536_v53  ;;  %v516_v0 = vadd.f32 %v515_v54, %v499_v59  ;;  %v530_v19 = vadd.f32 %v529_v12, %v514_v15  ;;  %v824_v12 = vld [vmem:[#allocation7 + $0x80] sm:$0xff] }
 0x1bd   :  { %v540_v57 = vpop.xlane.xlu1 %539 }
 0x1be   :  { %v531_v60 = vmul.f32 %v1568_v58, %v528_v55  ;;  %v543_v61 = vmul.f32 %v541_v56, %v541_v56  ;;  %v542_v62 = vmul.f32 0.001953125, %v540_v57  ;;  %v545_v16 = vmul.f32 %v1574_v63, %v541_v56 }
 0x1c0   :  { %v544_v1 = vsub.f32 %v542_v62, %v543_v61  ;;  %v532_v2 = vadd.f32 %v531_v60, %v516_v0  ;;  %v546_v25 = vadd.f32 %v545_v16, %v530_v19  ;;  %v830_v60 = vld [vmem:[#allocation7 + $0xb0] sm:$0xff] }
 0x1c2   :  { %v547_v3 = vmul.f32 %v1574_v63, %v544_v1 }
 0x1c4   :  { %v548_v4 = vadd.f32 %v547_v3, %v532_v2  ;;  %v829_v2 = vld [vmem:[#allocation7 + $0xa8] sm:$0xff] }
 0x1c6   :  { %v549_v6 = vadd.f32 1e-05, %v548_v4  ;;  %v828_v4 = vld [vmem:[#allocation7 + $0xa0] sm:$0xff] }
 0x1c8   :  { %1319 = vrsqrt.f32 %v549_v6 }
 0x1d5   :  { %v1320_v23 = vpop.eup %1319 }
 0x1d6   :  { %v551_v26 = vmul.f32 %v1320_v23, %v453_v18 }
 0x1d8   :  { %v552_v28 = vmul.f32 %v551_v26, %v546_v25  ;;  %v558_v24 = vrot.slane %v551_v26, %v1599_v21 }
 0x1da   :  { %v553_v29 = vsub.f32 %v454_v27, %v552_v28  ;;  %v560_v30 = vmul.f32 %v558_v24, %v1533_v10  ;;  %v561_v32 = vmul.f32 %v558_v24, %v1531_v5  ;;  %v562_v34 = vmul.f32 %v558_v24, %v1546_v22 }
 0x1db   :  { %v563_v35 = vmul.f32 %v558_v24, %v1541_v17 }
 0x1dc   :  { %v568_v31 = vrot.slane %v553_v29, %v1599_v21 }
 0x1de   :  { %v570_v36 = vadd.f32 %v568_v31, %v560_v30  ;;  %v571_v37 = vadd.f32 %v568_v31, %v561_v32  ;;  %v572_v38 = vadd.f32 %v568_v31, %v562_v34  ;;  %v573_v39 = vadd.f32 %v568_v31, %v563_v35 }
 0x1e0   :  { %v574_v40 = vmax.f32 %v570_v36, 0.0  ;;  %v575_v41 = vmax.f32 %v571_v37, 0.0  ;;  %v576_v42 = vmax.f32 %v572_v38, 0.0  ;;  %v577_v43 = vmax.f32 %v573_v39, 0.0 }
 0x1e2   :  { %v582_v44 = vrot.slane %v574_v40, 7  ;;  %v583_v45 = vrot.slane %v575_v41, 7  ;;  %v585_v46 = vrot.slane %v576_v42, 7  ;;  %v586_v10 = vrot.slane %v577_v43, 7 }
 0x1e4   :  { %v592_v47 = vsel %vm102_vm0, 0.0, %v582_v44  ;;  %v584_v5 = vsel %vm102_vm0, %v582_v44, %v583_v45  ;;  %v587_v22 = vsel %vm102_vm0, %v585_v46, %v586_v10  ;;  %v593_v17 = vsel %vm102_vm0, 0.0, %v585_v46 }
 0x1e5   :  { %v608_v48 = vrot.slane %v592_v47, 1  ;;  %1284 = vmatprep.mubr.msk.f32.mxu0 %vm149_vm2, %v592_v47  ;;  %v613_v50 = vrot.slane %v593_v17, 1  ;;  %v609_v51 = vrot.slane %v584_v5, 1  ;;  %v594_v53 = vsel %vm102_vm0, %v583_v45, 0.0 }
 0x1e6   :  { %1285 = vmatmul.mubr.msk.f32.vlgmr.msra.gmra.mxu0 %vm149_vm2, %v584_v5  ;;  %v614_v54 = vrot.slane %v587_v22, 1  ;;  %v595_v55 = vsel %vm102_vm0, %v586_v10, 0.0  ;;  %v611_v56 = vrot.slane %v594_v53, 1  ;;  %v813_v62 = vrot.slane %v592_v47, 2 }
 0x1e7   :  { %1287 = vmatprep.mubr.msk.f32.mxu0 %vm149_vm2, %v593_v17  ;;  %v610_v57 = vsel %vm129_vm1, %v608_v48, %v609_v51  ;;  %v616_v61 = vrot.slane %v595_v55, 1  ;;  %v814_v1 = vrot.slane %v584_v5, 2  ;;  %v816_v13 = vrot.slane %v594_v53, 2 }
 0x1e8   :  { %1262 = vmatprep.mubr.msk.f32.mxu1 %vm149_vm2, %v610_v57  ;;  %v612_v59 = vsel %vm129_vm1, %v609_v51, %v611_v56  ;;  %v615_v0 = vsel %vm129_vm1, %v613_v50, %v614_v54  ;;  %v818_v15 = vrot.slane %v593_v17, 2  ;;  %v819_v16 = vrot.slane %v587_v22, 2 }
 0x1e9   :  { %1263 = vmatmul.mubr.msk.f32.vlgmr.msra.gmra.mxu1 %vm149_vm2, %v612_v59  ;;  %v617_v3 = vsel %vm129_vm1, %v614_v54, %v616_v61  ;;  %v815_v6 = vsel %vm336_vm3, %v813_v62, %v814_v1  ;;  %v817_v18 = vsel %vm336_vm3, %v814_v1, %v816_v13  ;;  %v821_v19 = vrot.slane %v595_v55, 2 }
 0x1ea   :  { %1288 = vmatmul.mubr.msk.f32.gmra.mxu0 %vm149_vm2, %v587_v22  ;;  %1291 = vmatpush3.msra.mxu1 %v1584_v33  ;;  %v826_v33 = vld [vmem:[#allocation7 + $0x90] sm:$0xff]  ;;  %v820_v23 = vsel %vm336_vm3, %v818_v15, %v819_v16 }
 0x1eb   :  { %1265 = vmatprep.mubr.msk.f32.mxu1 %vm149_vm2, %v615_v0  ;;  %1292 = vmatprep.subr.mxu1 %v830_v60  ;;  %v822_v25 = vsel %vm336_vm3, %v819_v16, %v821_v19 }
 0x1ec   :  { %1293 = vmatpush3.msra.mxu1 %v830_v60 }
 0x1ed   :  { %1294 = vmatprep.subr.mxu1 %v829_v2  ;;  %1266 = vmatmul.mubr.msk.f32.gmra.mxu1 %vm149_vm2, %v617_v3 }
 0x1ee   :  { %1295 = vmatpush3.msra.mxu1 %v829_v2  ;;  %1306 = vmatprep.mubr.msk.f32.mxu1 %vm149_vm2, %v815_v6 }
 0x1ef   :  { %1296 = vmatprep.subr.mxu1 %v828_v4 }
 0x1f0   :  { %1297 = vmatpush3.msra.mxu1 %v828_v4 }
 0x1f1   :  { %1298 = vmatprep.subr.mxu1 %v827_v7 }
 0x1f2   :  { %1299 = vmatpush3.msra.mxu1 %v827_v7 }
 0x1f3   :  { %1300 = vmatprep.subr.mxu1 %v826_v33 }
 0x1f4   :  { %1301 = vmatpush3.msra.mxu1 %v826_v33 }
 0x1f5   :  { %1302 = vmatprep.subr.mxu1 %v825_v11 }
 0x1f6   :  { %1303 = vmatpush3.msra.mxu1 %v825_v11 }
 0x1f7   :  { %1304 = vmatprep.subr.mxu1 %v824_v12 }
 0x1f8   :  { %1305 = vmatpush3.msra.mxu1 %v824_v12 }
 0x1f9   :  { %1307 = vmatmul.mubr.msk.f32.vlgmr.msra.gmra.mxu1 %vm149_vm2, %v817_v18 }
 0x1fa   :  { %1309 = vmatprep.mubr.msk.f32.mxu1 %vm149_vm2, %v820_v23 }
 0x1fd   :  { %1310 = vmatmul.mubr.msk.f32.gmra.mxu1 %vm149_vm2, %v822_v25 }
 0x2a6   :  { %v1286_v28 = vpop.f32.mrf.mxu0 }
 0x2a8   :  { %v794_v29 = vpop.f32.mrf.mxu0 }
 0x2a9   :  { %v1264_v26 = vpop.f32.mrf.mxu1 }
 0x2aa   :  { %v800_v31 = vadd.f32 %v1286_v28, %v1264_v26  ;;  %v1289_v32 = vpop.f32.mrf.mxu0 }
 0x2ab   :  { %v701_v27 = vpop.f32.mrf.mxu1 }
 0x2ac   :  { %v795_v35 = vadd.f32 %v794_v29, %v701_v27  ;;  %v804_v38 = vpop.f32.mrf.mxu0 }
 0x2ad   :  { %v1267_v24 = vpop.f32.mrf.mxu1 }
 0x2ae   :  { %v810_v39 = vadd.f32 %v1289_v32, %v1267_v24 }
 0x2af   :  { %v711_v30 = vpop.f32.mrf.mxu1 }
 0x2b0   :  { %v805_v41 = vadd.f32 %v804_v38, %v711_v30 }
 0x2b9   :  { %v1308_v34 = vpop.f32.mrf.mxu1 }
 0x2ba   :  { %v1637_v36 = vadd.f32 %v1308_v34, %v800_v31 }
 0x2bb   :  { %v906_v37 = vpop.f32.mrf.mxu1 }
 0x2bc   :  { %v1639_v40 = vadd.f32 %v906_v37, %v795_v35  ;;  %v945_v43 = vmul.f32 %v1637_v36, %v1637_v36  ;;  %v932_v47 = vsel %vm149_vm2, %v1637_v36, 0.0 }
 0x2bd   :  { %v1311_v42 = vpop.f32.mrf.mxu1 }
 0x2be   :  { %v931_v44 = vsel %vm149_vm2, %v1639_v40, 0.0  ;;  %v944_v45 = vmul.f32 %v1639_v40, %v1639_v40  ;;  %v1647_v46 = vadd.f32 %v1311_v42, %v810_v39  ;;  %v949_v48 = vsel %vm149_vm2, %v945_v43, 0.0 }
 0x2bf   :  { %v916_v10 = vpop.f32.mrf.mxu1  ;;  %v933_v17 = vadd.f32 %v932_v47, %v931_v44 }
 0x2c0   :  { %v948_v5 = vsel %vm149_vm2, %v944_v45, 0.0  ;;  %v1652_v22 = vadd.f32 %v916_v10, %v805_v41  ;;  %v947_v50 = vmul.f32 %v1647_v46, %v1647_v46  ;;  %v936_v56 = vsel %vm149_vm2, %v1647_v46, 0.0 }
 0x2c1   :  { %v950_v54 = vadd.f32 %v949_v48, %v948_v5 }
 0x2c2   :  { %v934_v51 = vsel %vm149_vm2, %v1652_v22, 0.0  ;;  %v946_v53 = vmul.f32 %v1652_v22, %v1652_v22  ;;  %v953_v61 = vsel %vm149_vm2, %v947_v50, 0.0 }
 0x2c3   :  { %v935_v55 = vadd.f32 %v934_v51, %v933_v17 }
 0x2c4   :  { %v951_v57 = vsel %vm149_vm2, %v946_v53, 0.0 }
 0x2c5   :  { %v937_v59 = vadd.f32 %v936_v56, %v935_v55  ;;  %v952_v60 = vadd.f32 %v951_v57, %v950_v54 }
 0x2c7   :  { %v938_v62 = vrot.slane %v937_v59, 4  ;;  %v954_v0 = vadd.f32 %v953_v61, %v952_v60 }
 0x2c9   :  { %v939_v1 = vadd.f32 %v938_v62, %v937_v59  ;;  %v955_v2 = vrot.slane %v954_v0, 4 }
 0x2cb   :  { %v940_v3 = vrot.slane %v939_v1, 2  ;;  %v956_v4 = vadd.f32 %v955_v2, %v954_v0 }
 0x2cd   :  { %v941_v6 = vadd.f32 %v940_v3, %v939_v1  ;;  %v957_v7 = vrot.slane %v956_v4, 2 }
 0x2cf   :  { %v942_v33 = vrot.slane %v941_v6, 1  ;;  %v958_v11 = vadd.f32 %v957_v7, %v956_v4 }
 0x2d1   :  { %v943_v12 = vadd.f32 %v942_v33, %v941_v6  ;;  %v959_v13 = vrot.slane %v958_v11, 1 }
 0x2d3   :  { %v977_v15 = vmul.f32 %v1562_v52, %v943_v12  ;;  %v961_v16 = vmul.f32 %v1560_v49, %v943_v12  ;;  %v960_v18 = vadd.f32 %v959_v13, %v958_v11  ;;  %v993_v26 = vmul.f32 %v1568_v58, %v943_v12 }
 0x2d4   :  { %v1009_v34 = vmul.f32 %v1574_v63, %v943_v12 }
 0x2d5   :  { %v978_v19 = vsel %vm149_vm2, %v977_v15, 0.0  ;;  %v962_v23 = vsel %vm149_vm2, %v961_v16, 0.0  ;;  %v981_v25 = vmul.f32 %v1562_v52, %v960_v18  ;;  %v994_v28 = vsel %vm149_vm2, %v993_v26, 0.0 }
 0x2d6   :  { %979 = vadd.xlane.f32.xlu1 %v978_v19  ;;  %963 = vadd.xlane.f32.xlu0 %v962_v23  ;;  %v997_v24 = vmul.f32 %v1568_v58, %v960_v18  ;;  %v965_v29 = vmul.f32 %v1560_v49, %v960_v18  ;;  %v1013_v32 = vmul.f32 %v1574_v63, %v960_v18  ;;  %v1010_v37 = vsel %vm149_vm2, %v1009_v34, 0.0  ;;  %v929_v19 = vld [vmem:[%s1720_s5] sm:$0x1]  ;;  %s1415_s5 = smov [#allocation8]  }
 0x2d7   :  { %v982_v27 = vsel %vm149_vm2, %v981_v25, 0.0 }
 0x2d8   :  { %v998_v30 = vsel %vm149_vm2, %v997_v24, 0.0  ;;  %v966_v31 = vsel %vm149_vm2, %v965_v29, 0.0  ;;  %v1014_v35 = vsel %vm149_vm2, %v1013_v32, 0.0 }
 0x2da   :  { %983 = vadd.xlane.f32.xlu1 %v982_v27  ;;  %995 = vadd.xlane.f32.xlu0 %v994_v28  ;;  %v930_v28 = vld [vmem:[%s1721_s6] sm:$0x1]  ;;  %s1067_s6 = sshll.u32 %s1415_s5, 4  ;;  %s1068_s6 = int_to_ptr.vmem [resolvable:$true] %s1067_s6 }
 0x2db   :  { %s1383_s21 = scalar_lea.vmem %s1068_s6, 512  ;;  %p1388_p2 = scmp.lt.s32.totalorder %s1068_s6, %s1068_s6 }
 0x2dc   :  { %p1384_p1 = scmp.ne.s32.totalorder %s1068_s6, %s1383_s21  ;;  %p1389_p3 = scmp.lt.s32.totalorder %s1383_s21, %s1383_s21 }
 0x2de   :  { %999 = vadd.xlane.f32.xlu1 %v998_v30  ;;  %967 = vadd.xlane.f32.xlu0 %v966_v31  ;;  %p1390_p4 = por %p1389_p3, %p1388_p2 }
 0x2e0   :  { %p1391_p5 = pnand %p1390_p4, %p1384_p1 }
 0x2e2   :  { %1015 = vadd.xlane.f32.xlu1 %v1014_v35  ;;  %1011 = vadd.xlane.f32.xlu0 %v1010_v37 }
 0x35f   :  { %v980_v38 = vpop.xlane.xlu1 %979  ;;  %v964_v39 = vpop.xlane.xlu0 %963 }
 0x360   :  { %v985_v41 = vmul.f32 0.001953125, %v980_v38  ;;  %v969_v44 = vmul.f32 0.001953125, %v964_v39 }
 0x362   :  { %v987_v10 = vmul.f32 %v985_v41, %v985_v41  ;;  %v971_v48 = vmul.f32 %v969_v44, %v969_v44  ;;  %v989_v12 = vmul.f32 %v1562_v52, %v985_v41  ;;  %v973_v13 = vmul.f32 %v1560_v49, %v969_v44 }
 0x363   :  { %v984_v42 = vpop.xlane.xlu1 %983  ;;  %v996_v43 = vpop.xlane.xlu0 %995 }
 0x364   :  { %v986_v45 = vmul.f32 0.001953125, %v984_v42  ;;  %v1001_v47 = vmul.f32 0.001953125, %v996_v43  ;;  %v990_v16 = vadd.f32 %v989_v12, %v973_v13 }
 0x366   :  { %v988_v50 = vsub.f32 %v986_v45, %v987_v10  ;;  %v1003_v54 = vmul.f32 %v1001_v47, %v1001_v47  ;;  %v1005_v15 = vmul.f32 %v1568_v58, %v1001_v47 }
 0x367   :  { %v1000_v5 = vpop.xlane.xlu1 %999  ;;  %v968_v17 = vpop.xlane.xlu0 %967 }
 0x368   :  { %v1002_v51 = vmul.f32 0.001953125, %v1000_v5  ;;  %v970_v53 = vmul.f32 0.001953125, %v968_v17  ;;  %v991_v59 = vmul.f32 %v1562_v52, %v988_v50  ;;  %v1006_v23 = vadd.f32 %v1005_v15, %v990_v16 }
 0x36a   :  { %v972_v55 = vsub.f32 %v970_v53, %v971_v48  ;;  %v1004_v60 = vsub.f32 %v1002_v51, %v1003_v54 }
 0x36b   :  { %v1016_v56 = vpop.xlane.xlu1 %1015  ;;  %v1012_v57 = vpop.xlane.xlu0 %1011 }
 0x36c   :  { %v975_v61 = vmul.f32 %v1560_v49, %v972_v55  ;;  %v1017_v62 = vmul.f32 0.001953125, %v1012_v57  ;;  %v1018_v1 = vmul.f32 0.001953125, %v1016_v56  ;;  %v1007_v3 = vmul.f32 %v1568_v58, %v1004_v60 }
 0x36e   :  { %v992_v0 = vadd.f32 %v991_v59, %v975_v61  ;;  %v1019_v2 = vmul.f32 %v1017_v62, %v1017_v62  ;;  %v1021_v18 = vmul.f32 %v1574_v63, %v1017_v62 }
 0x370   :  { %v1020_v4 = vsub.f32 %v1018_v1, %v1019_v2  ;;  %v1008_v6 = vadd.f32 %v1007_v3, %v992_v0  ;;  %v1022_v26 = vadd.f32 %v1021_v18, %v1006_v23 }
 0x372   :  { %v1023_v7 = vmul.f32 %v1574_v63, %v1020_v4 }
 0x374   :  { %v1024_v33 = vadd.f32 %v1023_v7, %v1008_v6 }
 0x376   :  { %v1025_v11 = vadd.f32 1e-05, %v1024_v33 }
 0x378   :  { %1321 = vrsqrt.f32 %v1025_v11 }
 0x385   :  { %v1322_v25 = vpop.eup %1321 }
 0x386   :  { %v1027_v27 = vmul.f32 %v1322_v25, %v929_v19 }
 0x388   :  { %v1028_v52 = vmul.f32 %v1027_v27, %v1022_v26  ;;  %v1034_v49 = vrot.slane %v1027_v27, %v1599_v21 }
 0x38a   :  { %v1029_v24 = vsub.f32 %v930_v28, %v1028_v52  ;;  %v1036_v58 = vmul.f32 %v1034_v49, %v1639_v40  ;;  %v1037_v29 = vmul.f32 %v1034_v49, %v1637_v36  ;;  %v1038_v30 = vmul.f32 %v1034_v49, %v1652_v22 }
 0x38b   :  { %v1039_v31 = vmul.f32 %v1034_v49, %v1647_v46 }
 0x38c   :  { %v1044_v63 = vrot.slane %v1029_v24, %v1599_v21 }
 0x38e   :  { %v1046_v32 = vadd.f32 %v1044_v63, %v1036_v58  ;;  %v1047_v34 = vadd.f32 %v1044_v63, %v1037_v29  ;;  %v1048_v35 = vadd.f32 %v1044_v63, %v1038_v30  ;;  %v1049_v37 = vadd.f32 %v1044_v63, %v1039_v31 }
 0x390   :  { %v1050_v38 = vadd.f32 %v1046_v32, %v1474_v8  ;;  %v1051_v39 = vadd.f32 %v1047_v34, %v1476_v9  ;;  %v1052_v40 = vadd.f32 %v1048_v35, %v1480_v14  ;;  %v1053_v21 = vadd.f32 %v1049_v37, %v1489_v20 }
 0x392   :  { %v1054_v41 = vmax.f32 %v1050_v38, 0.0  ;;  %v1055_v36 = vmax.f32 %v1051_v39, 0.0  ;;  %v1056_v42 = vmax.f32 %v1052_v40, 0.0  ;;  %v1057_v22 = vmax.f32 %v1053_v21, 0.0 }
 0x394   :  { %1058 = vst.msk [vmem:[#allocation8] sm:$0xff] %vm149_vm2, %v1054_v41  ;;  %1059 = vst.msk [vmem:[#allocation8 + $0x8] sm:$0xff] %vm149_vm2, %v1055_v36 }
 0x395   :  { %1060 = vst.msk [vmem:[#allocation8 + $0x10] sm:$0xff] %vm149_vm2, %v1056_v42  ;;  %1061 = vst.msk [vmem:[#allocation8 + $0x18] sm:$0xff] %vm149_vm2, %v1057_v22 }
 0x396   :  { %1394 = shalt.err (!%p1391_p5)
}
 0x397   :  { %1073 = dma.vmem_to_hbm [thread:$0]  %s1068_s6, 512, %s1722_s7, [#allocation4], %s1411_s29, %s1411_s29, %s1412_s30  }
 0x398   :  { %1407 = dma.done.wait [#allocation4], 512  }
 0x399   :  { %1408 = vsyncadd [#allocation4], 4294966784 }
 0x39a   :  { %1077 = vsyncpa [#allocation3], 1 }
 0x39b   :  { %1078 = vsyncpa [#allocation6], 1 }
 0x39c   :  { %1079 = vsyncpa [#allocation4], 1 }

</bundles_post_ra>
